<compile_context>
chip_gen: v7x
topology: tpu7x:2x2x1
jax: 0.10.0
libtpu: 0.0.40
codegen_flags: <defaults>
</compile_context>

<pallas_src>
import functools

import jax
import jax.numpy as jnp
from jax.experimental import pallas as pl
from jax.experimental.pallas import tpu as pltpu

NEG_SLOPE = 0.01  # F.leaky_relu default negative slope


def _cdiv(a, b):
    return -(-a // b)


def _round_up(v, m):
    return _cdiv(v, m) * m


def _leaky_relu(v):
    # max(x, a*x) == leaky_relu(x) for 0 <= a <= 1: mul + max (2 VALU ops/elem)
    # instead of where()'s cmp + mul + select (3).
    return jnp.maximum(v, NEG_SLOPE * v)


def mlp_rew_kernel(x_ref, w1_ref, b1_ref, wb1_ref, bb1_ref, wb2_ref, bb2_ref,
                   w4_ref, b4_ref, ot_ref):
    cd = w1_ref.dtype  # MXU input dtype (bf16 by default; f32 for strict parity)

    # X arrives as f32 (one HBM read); cast to the MXU dtype on the VPU here
    # instead of paying a separate XLA cast pass over X in the wrapper.
    x = x_ref[...].astype(cd)

    # fc1 + leaky_relu (f32 accumulation, f32 epilogue).
    h = jnp.dot(x, w1_ref[...], preferred_element_type=jnp.float32) + b1_ref[...]
    h = _leaky_relu(h)

    # ResidualBlock: fc1 -> leaky_relu -> fc2 -> +residual -> leaky_relu.
    residual = h
    h1 = jnp.dot(h.astype(cd), wb1_ref[...],
                 preferred_element_type=jnp.float32) + bb1_ref[...]
    h1 = _leaky_relu(h1)
    h2 = jnp.dot(h1.astype(cd), wb2_ref[...],
                 preferred_element_type=jnp.float32) + bb2_ref[...]
    h2 = _leaky_relu(h2 + residual)

    # fc4, computed transposed: out^T = W4 @ h2^T so the (out_dim, block_b)
    # store is lane-dense along the batch.  out_dim is tiny (e.g. 8), so the
    # natural (block_b, out_dim) layout would force masked vst + a narrow
    # write-back DMA.  The f32 (block_b,128)->(128,block_b) transpose is
    # (8,128)-aligned and uses the otherwise-idle XLU slot.
    h2_t = jnp.transpose(h2).astype(cd)
    out_t = jnp.dot(w4_ref[...], h2_t,
                    preferred_element_type=jnp.float32) + b4_ref[...]
    ot_ref[...] = out_t.astype(ot_ref.dtype)


def prepare_params(params, compute_dtype=jnp.bfloat16):
    """One-time weight preparation (transpose / zero-pad / cast).

    Call ONCE outside the hot loop and pass the result to mlp_network_rew; the
    ~10 small transpose/pad/cast ops would otherwise run on every forward call
    and can rival the kernel's own runtime.

    params: dict name -> (weight, bias), PyTorch convention weight=[out, in].
      Names: "fc1", "block_fc1", "block_fc2", "fc4"
      ("block_*" == hidden_blocks[0].fc1/fc2; the module's fc2/fc3 are unused).
    compute_dtype: MXU input dtype.  bfloat16 (default) halves weight/X traffic
      and feeds the MXU at native rate; pass jnp.float32 for strict f32 parity.
      Accumulation and the element-wise epilogue are f32 either way.
    """
    in_dim = params["fc1"][0].shape[1]
    hidden = params["fc1"][0].shape[0]
    hidden_p = _round_up(hidden, 128)  # lane-dense hidden width

    def pad_t(name, rows, cols):
        # weight -> [in, out] zero-padded to (rows, cols); bias -> [1, cols] f32.
        # Zero padding keeps results exact on real lanes (leaky_relu(0) == 0).
        w, b = params[name]
        w = jnp.asarray(w, jnp.float32).T
        w = jnp.pad(w, ((0, rows - w.shape[0]), (0, cols - w.shape[1])))
        b = jnp.pad(jnp.asarray(b, jnp.float32), (0, cols - b.shape[0]))
        return w.astype(compute_dtype), b.reshape(1, -1)

    w1, b1 = pad_t("fc1", in_dim, hidden_p)
    wb1, bb1 = pad_t("block_fc1", hidden_p, hidden_p)
    wb2, bb2 = pad_t("block_fc2", hidden_p, hidden_p)

    # fc4 stays in PyTorch [out, in] layout (zero-padded along the hidden axis):
    # the kernel computes out^T = W4 @ h2^T directly.  Bias as a column [out, 1].
    w4, b4 = params["fc4"]
    w4 = jnp.asarray(w4, jnp.float32)
    w4 = jnp.pad(w4, ((0, 0), (0, hidden_p - w4.shape[1]))).astype(compute_dtype)
    b4 = jnp.asarray(b4, jnp.float32).reshape(-1, 1)

    return dict(w1=w1, b1=b1, wb1=wb1, bb1=bb1, wb2=wb2, bb2=bb2, w4=w4, b4=b4)


def _choose_tiling(B, block_b):
    """Pick (tile_rows, padded_batch, num_tiles).

    Tiles are 128-row aligned (lane-dense transposed store, full vregs in every
    VPU op).  For B >= 256 the tile count is forced even and >= 2 so the
    "parallel" grid axis splits evenly across v7x's two TensorCores; padding
    waste is bounded by < 128 rows per tile.
    """
    n = max(1, _cdiv(B, block_b))
    if B >= 256:
        n = max(n, 2)
        n += n % 2
    else:
        n = 1
    block = _round_up(_cdiv(B, n), 128)
    return block, n * block, n


def _vmem_limit_bytes(block, in_dim, hidden_p, out_dim, weight_bytes):
    # f32 intermediates (h / residual / h1 / h2 / h2^T + headroom) plus the
    # double-buffered f32 X and out^T tiles plus the resident weights.
    est = (6 * block * hidden_p * 4
           + 2 * block * in_dim * 4
           + 2 * out_dim * block * 4
           + 2 * weight_bytes)
    # >= 32 MiB so big tiles don't hit v5e's 16 MiB default scoped-VMEM limit;
    # <= 48 MiB to stay comfortably inside v7x's 64 MiB physical VMEM per core.
    return int(min(max(2 * est, 32 * 1024 * 1024), 48 * 1024 * 1024))


@functools.partial(jax.jit, static_argnames=("block_b",))
def mlp_network_rew(x, prepared, block_b=2048):
    """MLPNetworkRew.forward.

    x: [B, input_dim] float32.  prepared: output of prepare_params().
    Returns [B, out_dim] in x.dtype.
    """
    B, in_dim = x.shape
    w1 = prepared["w1"]
    assert w1.shape[0] == in_dim, "input_dim mismatch with prepared params"
    hidden_p = w1.shape[1]
    out_dim = prepared["w4"].shape[0]

    block, B_pad, n_tiles = _choose_tiling(B, block_b)
    if B_pad != B:
        x = jnp.pad(x, ((0, B_pad - B), (0, 0)))   # padded rows never reach real outputs

    weight_bytes = sum(int(a.size) * a.dtype.itemsize for a in prepared.values())
    vmem_limit = _vmem_limit_bytes(block, in_dim, hidden_p, out_dim, weight_bytes)

    # Weights/biases use constant index maps: their block index never changes,
    # so Pallas only DMAs them on the first grid step (effectively resident).
    def resident(a):
        return pl.BlockSpec(a.shape, lambda i: (0, 0))

    out_t = pl.pallas_call(
        mlp_rew_kernel,
        out_shape=jax.ShapeDtypeStruct((out_dim, B_pad), x.dtype),
        grid_spec=pltpu.PrefetchScalarGridSpec(
            num_scalar_prefetch=0,
            grid=(n_tiles,),
            in_specs=[
                pl.BlockSpec((block, in_dim), lambda i: (i, 0)),   # f32 X tile
                resident(prepared["w1"]), resident(prepared["b1"]),
                resident(prepared["wb1"]), resident(prepared["bb1"]),
                resident(prepared["wb2"]), resident(prepared["bb2"]),
                resident(prepared["w4"]), resident(prepared["b4"]),
            ],
            out_specs=pl.BlockSpec((out_dim, block), lambda i: (0, i)),
        ),
        compiler_params=pltpu.CompilerParams(
            dimension_semantics=("parallel",),
            vmem_limit_bytes=vmem_limit),
    )(x, prepared["w1"], prepared["b1"], prepared["wb1"], prepared["bb1"],
      prepared["wb2"], prepared["bb2"], prepared["w4"], prepared["b4"])

    # out_t is (out_dim, B_pad); slice + transpose back is cheap layout plumbing.
    return out_t[:, :B].T


def init_linear(key, in_dim, out_dim):
    """Deterministic init mimicking nn.Linear's default uniform(-1/sqrt(fan_in), .)."""
    kw, kb = jax.random.split(key)
    bound = 1.0 / jnp.sqrt(in_dim)
    w = jax.random.uniform(kw, (out_dim, in_dim), jnp.float32, -bound, bound)
    b = jax.random.uniform(kb, (out_dim,), jnp.float32, -bound, bound)
    return w, b


def reference_forward(x, params, compute_dtype=jnp.bfloat16):
    """Pure-JAX reference mirroring the kernel's numerics (bf16 MXU inputs,
    f32 accumulation, f32 element-wise epilogue)."""
    cd = compute_dtype

    def lin(name, v):
        w, b = params[name]
        return jnp.dot(v.astype(cd), w.T.astype(cd),
                       preferred_element_type=jnp.float32) + b

    h = jax.nn.leaky_relu(lin("fc1", x), NEG_SLOPE)
    r = h
    h1 = jax.nn.leaky_relu(lin("block_fc1", h), NEG_SLOPE)
    h2 = jax.nn.leaky_relu(lin("block_fc2", h1) + r, NEG_SLOPE)
    return lin("fc4", h2)


if __name__ == "__main__":
    input_dim, hidden_dim, out_dim = 32, 64, 8

    key = jax.random.PRNGKey(0)
    k_x1, k_x2, k1, k2, k3, k4 = jax.random.split(key, 6)

    params = {
        "fc1": init_linear(k1, input_dim, hidden_dim),
        "block_fc1": init_linear(k2, hidden_dim, hidden_dim),
        "block_fc2": init_linear(k3, hidden_dim, hidden_dim),
        "fc4": init_linear(k4, hidden_dim, out_dim),
    }
    prepared = prepare_params(params)   # one-time weight prep, outside the hot path

    # batch=12 -> single 128-row tile (padding path); batch=300 -> two 256-row
    # tiles (multi-program "parallel" grid + padding path).
    for batch, kx in ((12, k_x1), (300, k_x2)):
        x = jax.random.normal(kx, (batch, input_dim), jnp.float32)
        out = jax.block_until_ready(mlp_network_rew(x, prepared))
        ref = reference_forward(x, params)
        assert out.shape == (batch, out_dim)
        assert jnp.allclose(out, ref, atol=1e-3, rtol=1e-3), "mismatch vs JAX reference"

    print("KERNEL_OK")
</pallas_src>

<mosaic_0001>
module attributes {stable_mosaic.version = 11 : i64} {
  func.func @mlp_rew_kernel(%arg0: i32, %arg1: memref<128x32xf32, #tpu.memory_space<vmem>>, %arg2: memref<32x128xbf16, #tpu.memory_space<vmem>>, %arg3: memref<1x128xf32, #tpu.memory_space<vmem>>, %arg4: memref<128x128xbf16, #tpu.memory_space<vmem>>, %arg5: memref<1x128xf32, #tpu.memory_space<vmem>>, %arg6: memref<128x128xbf16, #tpu.memory_space<vmem>>, %arg7: memref<1x128xf32, #tpu.memory_space<vmem>>, %arg8: memref<8x128xbf16, #tpu.memory_space<vmem>>, %arg9: memref<8x1xf32, #tpu.memory_space<vmem>>, %arg10: memref<8x128xf32, #tpu.memory_space<vmem>>) attributes {dimension_semantics = [#tpu.dimension_semantics<parallel>], iteration_bounds = array<i64: 1>, scalar_prefetch = 0 : i64, scratch_operands = 0 : i64, tpu.core_type = #tpu.core_type<tc>, window_params = [{transform_indices = @transform_0, window_bounds = array<i64: 128, 32>}, {pipeline_mode = #tpu.pipeline_mode<synchronous>, transform_indices = @transform_1, window_bounds = array<i64: 32, 128>}, {pipeline_mode = #tpu.pipeline_mode<synchronous>, transform_indices = @transform_2, window_bounds = array<i64: 1, 128>}, {pipeline_mode = #tpu.pipeline_mode<synchronous>, transform_indices = @transform_3, window_bounds = array<i64: 128, 128>}, {pipeline_mode = #tpu.pipeline_mode<synchronous>, transform_indices = @transform_4, window_bounds = array<i64: 1, 128>}, {pipeline_mode = #tpu.pipeline_mode<synchronous>, transform_indices = @transform_5, window_bounds = array<i64: 128, 128>}, {pipeline_mode = #tpu.pipeline_mode<synchronous>, transform_indices = @transform_6, window_bounds = array<i64: 1, 128>}, {pipeline_mode = #tpu.pipeline_mode<synchronous>, transform_indices = @transform_7, window_bounds = array<i64: 8, 128>}, {pipeline_mode = #tpu.pipeline_mode<synchronous>, transform_indices = @transform_8, window_bounds = array<i64: 8, 1>}, {transform_indices = @transform_9, window_bounds = array<i64: 8, 128>}]} {
    %c0 = arith.constant 0 : index
    %c0_0 = arith.constant 0 : index
    %0 = vector.load %arg1[%c0, %c0_0] : memref<128x32xf32, #tpu.memory_space<vmem>>, vector<128x32xf32>
    %1 = arith.truncf %0 : vector<128x32xf32> to vector<128x32xbf16>
    %c0_1 = arith.constant 0 : index
    %c0_2 = arith.constant 0 : index
    %2 = vector.load %arg2[%c0_1, %c0_2] : memref<32x128xbf16, #tpu.memory_space<vmem>>, vector<32x128xbf16>
    %cst = arith.constant dense<0.000000e+00> : vector<128x128xf32>
    %3 = tpu.matmul %1, %2, %cst {dimension_numbers = #tpu.dot_dimension_numbers<[1], [0], [0], [1], [0, 0, 1, 1], [], []>} : vector<128x32xbf16>, vector<32x128xbf16>, vector<128x128xf32> -> vector<128x128xf32>
    %c0_3 = arith.constant 0 : index
    %c0_4 = arith.constant 0 : index
    %4 = vector.load %arg3[%c0_3, %c0_4] : memref<1x128xf32, #tpu.memory_space<vmem>>, vector<1x128xf32>
    %5 = vector.broadcast %4 : vector<1x128xf32> to vector<128x128xf32>
    %6 = arith.addf %3, %5 : vector<128x128xf32>
    %cst_5 = arith.constant 0.00999999977 : f32
    %7 = vector.broadcast %cst_5 : f32 to vector<128x128xf32>
    %8 = arith.mulf %7, %6 : vector<128x128xf32>
    %9 = arith.maximumf %6, %8 : vector<128x128xf32>
    %10 = arith.truncf %9 : vector<128x128xf32> to vector<128x128xbf16>
    %c0_6 = arith.constant 0 : index
    %c0_7 = arith.constant 0 : index
    %11 = vector.load %arg4[%c0_6, %c0_7] : memref<128x128xbf16, #tpu.memory_space<vmem>>, vector<128x128xbf16>
    %cst_8 = arith.constant dense<0.000000e+00> : vector<128x128xf32>
    %12 = tpu.matmul %10, %11, %cst_8 {dimension_numbers = #tpu.dot_dimension_numbers<[1], [0], [0], [1], [0, 0, 1, 1], [], []>} : vector<128x128xbf16>, vector<128x128xbf16>, vector<128x128xf32> -> vector<128x128xf32>
    %c0_9 = arith.constant 0 : index
    %c0_10 = arith.constant 0 : index
    %13 = vector.load %arg5[%c0_9, %c0_10] : memref<1x128xf32, #tpu.memory_space<vmem>>, vector<1x128xf32>
    %14 = vector.broadcast %13 : vector<1x128xf32> to vector<128x128xf32>
    %15 = arith.addf %12, %14 : vector<128x128xf32>
    %cst_11 = arith.constant 0.00999999977 : f32
    %16 = vector.broadcast %cst_11 : f32 to vector<128x128xf32>
    %17 = arith.mulf %16, %15 : vector<128x128xf32>
    %18 = arith.maximumf %15, %17 : vector<128x128xf32>
    %19 = arith.truncf %18 : vector<128x128xf32> to vector<128x128xbf16>
    %c0_12 = arith.constant 0 : index
    %c0_13 = arith.constant 0 : index
    %20 = vector.load %arg6[%c0_12, %c0_13] : memref<128x128xbf16, #tpu.memory_space<vmem>>, vector<128x128xbf16>
    %cst_14 = arith.constant dense<0.000000e+00> : vector<128x128xf32>
    %21 = tpu.matmul %19, %20, %cst_14 {dimension_numbers = #tpu.dot_dimension_numbers<[1], [0], [0], [1], [0, 0, 1, 1], [], []>} : vector<128x128xbf16>, vector<128x128xbf16>, vector<128x128xf32> -> vector<128x128xf32>
    %c0_15 = arith.constant 0 : index
    %c0_16 = arith.constant 0 : index
    %22 = vector.load %arg7[%c0_15, %c0_16] : memref<1x128xf32, #tpu.memory_space<vmem>>, vector<1x128xf32>
    %23 = vector.broadcast %22 : vector<1x128xf32> to vector<128x128xf32>
    %24 = arith.addf %21, %23 : vector<128x128xf32>
    %25 = arith.addf %24, %9 : vector<128x128xf32>
    %cst_17 = arith.constant 0.00999999977 : f32
    %26 = vector.broadcast %cst_17 : f32 to vector<128x128xf32>
    %27 = arith.mulf %26, %25 : vector<128x128xf32>
    %28 = arith.maximumf %25, %27 : vector<128x128xf32>
    %29 = tpu.transpose %28, [1, 0] : vector<128x128xf32> -> vector<128x128xf32>
    %30 = arith.truncf %29 : vector<128x128xf32> to vector<128x128xbf16>
    %c0_18 = arith.constant 0 : index
    %c0_19 = arith.constant 0 : index
    %31 = vector.load %arg8[%c0_18, %c0_19] : memref<8x128xbf16, #tpu.memory_space<vmem>>, vector<8x128xbf16>
    %cst_20 = arith.constant dense<0.000000e+00> : vector<8x128xf32>
    %32 = tpu.matmul %31, %30, %cst_20 {dimension_numbers = #tpu.dot_dimension_numbers<[1], [0], [0], [1], [0, 0, 1, 1], [], []>} : vector<8x128xbf16>, vector<128x128xbf16>, vector<8x128xf32> -> vector<8x128xf32>
    %c0_21 = arith.constant 0 : index
    %c0_22 = arith.constant 0 : index
    %33 = vector.load %arg9[%c0_21, %c0_22] : memref<8x1xf32, #tpu.memory_space<vmem>>, vector<8x1xf32>
    %34 = vector.broadcast %33 : vector<8x1xf32> to vector<8x128xf32>
    %35 = arith.addf %32, %34 : vector<8x128xf32>
    %c0_23 = arith.constant 0 : index
    %c0_24 = arith.constant 0 : index
    %36 = vector.load %arg10[%c0_23, %c0_24] : memref<8x128xf32, #tpu.memory_space<vmem>>, vector<8x128xf32>
    tpu.vector_store %arg10[%c0_23, %c0_24], %35 {strides = array<i32>} : memref<8x128xf32, #tpu.memory_space<vmem>>, vector<8x128xf32>,
    return
  }
  func.func @transform_0(%arg0: i32) -> (i32, i32) {
    %c0_i32 = arith.constant 0 : i32
    %c0_i32_0 = arith.constant 0 : i32
    return %arg0, %c0_i32 : i32, i32
  }
  func.func @transform_1(%arg0: i32) -> (i32, i32) {
    %c0_i32 = arith.constant 0 : i32
    %c0_i32_0 = arith.constant 0 : i32
    %c0_i32_1 = arith.constant 0 : i32
    return %c0_i32, %c0_i32_0 : i32, i32
  }
  func.func @transform_2(%arg0: i32) -> (i32, i32) {
    %c0_i32 = arith.constant 0 : i32
    %c0_i32_0 = arith.constant 0 : i32
    %c0_i32_1 = arith.constant 0 : i32
    return %c0_i32, %c0_i32_0 : i32, i32
  }
  func.func @transform_3(%arg0: i32) -> (i32, i32) {
    %c0_i32 = arith.constant 0 : i32
    %c0_i32_0 = arith.constant 0 : i32
    %c0_i32_1 = arith.constant 0 : i32
    return %c0_i32, %c0_i32_0 : i32, i32
  }
  func.func @transform_4(%arg0: i32) -> (i32, i32) {
    %c0_i32 = arith.constant 0 : i32
    %c0_i32_0 = arith.constant 0 : i32
    %c0_i32_1 = arith.constant 0 : i32
    return %c0_i32, %c0_i32_0 : i32, i32
  }
  func.func @transform_5(%arg0: i32) -> (i32, i32) {
    %c0_i32 = arith.constant 0 : i32
    %c0_i32_0 = arith.constant 0 : i32
    %c0_i32_1 = arith.constant 0 : i32
    return %c0_i32, %c0_i32_0 : i32, i32
  }
  func.func @transform_6(%arg0: i32) -> (i32, i32) {
    %c0_i32 = arith.constant 0 : i32
    %c0_i32_0 = arith.constant 0 : i32
    %c0_i32_1 = arith.constant 0 : i32
    return %c0_i32, %c0_i32_0 : i32, i32
  }
  func.func @transform_7(%arg0: i32) -> (i32, i32) {
    %c0_i32 = arith.constant 0 : i32
    %c0_i32_0 = arith.constant 0 : i32
    %c0_i32_1 = arith.constant 0 : i32
    return %c0_i32, %c0_i32_0 : i32, i32
  }
  func.func @transform_8(%arg0: i32) -> (i32, i32) {
    %c0_i32 = arith.constant 0 : i32
    %c0_i32_0 = arith.constant 0 : i32
    %c0_i32_1 = arith.constant 0 : i32
    return %c0_i32, %c0_i32_0 : i32, i32
  }
  func.func @transform_9(%arg0: i32) -> (i32, i32) {
    %c0_i32 = arith.constant 0 : i32
    %c0_i32_0 = arith.constant 0 : i32
    return %c0_i32, %arg0 : i32, i32
  }
}

</mosaic_0001>

<bundles_post_ra>
// kernel: mlp_network_rew.1
= control target key start
LH: loop header
LB: loop body
LE: loop exit
PB: predicated region body
PF: predicated region fallthrough
CT: control target
= control target key end

     0   :  { %vm80_vm0 = vcmask 261120   ;;  %vm966_vm1 = vmmov 0   ;;  %s1273_s1 = inlined_call_operand.vmem [shape: bf16[32,128], index: 1, kind: input, shape index: {}]   ;;  %s1274_s0 = inlined_call_operand.vmem [shape: f32[128,32], index: 0, kind: input, shape index: {}]   ;;  %s1275_s3 = inlined_call_operand.vmem [shape: bf16[128,128], index: 3, kind: input, shape index: {}]   ;;  %s1276_s5 = inlined_call_operand.vmem [shape: bf16[128,128], index: 5, kind: input, shape index: {}]   ;;  %s1277_s2 = inlined_call_operand.vmem [shape: f32[1,128], index: 2, kind: input, shape index: {}]   ;;  %s1278_s4 = inlined_call_operand.vmem [shape: f32[1,128], index: 4, kind: input, shape index: {}]   ;;  %s1279_s6 = inlined_call_operand.vmem [shape: f32[1,128], index: 6, kind: input, shape index: {}]   ;;  %s1280_s8 = inlined_call_operand.vmem [shape: f32[8,1], index: 8, kind: input, shape index: {}]   ;;  %s1281_s7 = inlined_call_operand.vmem [shape: bf16[8,128], index: 7, kind: input, shape index: {}]   ;;  %s1282_s9 = inlined_call_operand.vmem [shape: f32[8,128], index: 9, kind: output, shape index: {}]  }
   0x1   :  { %v947_v0 = vld [vmem:[%s1273_s1] sm:$0xff]   ;;  %v948_v1 = vld [vmem:[%s1273_s1 + $0x8] sm:$0xff]   ;;  %v35_v5 = vld [vmem:[%s1274_s0 + $0x10] sm:$0xff] }
   0x2   :  { %838 = vmatprep.subr.bf16.mxu0 %v947_v0  ;;  %v33_v2 = vld [vmem:[%s1274_s0] sm:$0xff]  ;;  %v34_v3 = vld [vmem:[%s1274_s0 + $0x8] sm:$0xff]  ;;  %v36_v6 = vld [vmem:[%s1274_s0 + $0x18] sm:$0xff] }
   0x3   :  { %839 = vmatpush3.bf16.msra.mxu0 %v947_v0  ;;  %v49_v4 = vpack.c.bf16 %v34_v3, %v33_v2  ;;  %v37_v7 = vld [vmem:[%s1274_s0 + $0x20] sm:$0xff]  ;;  %v38_v8 = vld [vmem:[%s1274_s0 + $0x28] sm:$0xff]  ;;  %v50_v9 = vpack.c.bf16 %v36_v6, %v35_v5  ;;  %v39_v12 = vld [vmem:[%s1274_s0 + $0x30] sm:$0xff] }
   0x4   :  { %840 = vmatprep.subr.bf16.mxu0 %v948_v1  ;;  %v51_v10 = vpack.c.bf16 %v38_v8, %v37_v7  ;;  %v949_v11 = vld [vmem:[%s1275_s3] sm:$0xff]   ;;  %v40_v13 = vld [vmem:[%s1274_s0 + $0x38] sm:$0xff]  ;;  %v950_v14 = vld [vmem:[%s1275_s3 + $0x8] sm:$0xff]  }
   0x5   :  { %842 = vmatprep.mubr.msk.bf16.mxu0 %vm80_vm0, %v49_v4  ;;  %v41_v15 = vld [vmem:[%s1274_s0 + $0x40] sm:$0xff]  ;;  %858 = vmatprep.subr.bf16.mxu1 %v949_v11  ;;  %v42_v16 = vld [vmem:[%s1274_s0 + $0x48] sm:$0xff]  ;;  %v951_v17 = vld [vmem:[%s1275_s3 + $0x10] sm:$0xff]   ;;  %v52_v18 = vpack.c.bf16 %v40_v13, %v39_v12 }
   0x6   :  { %859 = vmatpush3.bf16.msra.mxu1 %v949_v11  ;;  %v53_v19 = vpack.c.bf16 %v42_v16, %v41_v15  ;;  %v952_v20 = vld [vmem:[%s1275_s3 + $0x18] sm:$0xff]   ;;  %v43_v21 = vld [vmem:[%s1274_s0 + $0x50] sm:$0xff]  ;;  %v45_v23 = vld [vmem:[%s1274_s0 + $0x60] sm:$0xff] }
   0x7   :  { %841 = vmatpush3.bf16.msra.mxu0 %v948_v1  ;;  %860 = vmatprep.subr.bf16.mxu1 %v950_v14  ;;  %v44_v22 = vld [vmem:[%s1274_s0 + $0x58] sm:$0xff]  ;;  %v46_v24 = vld [vmem:[%s1274_s0 + $0x68] sm:$0xff]  ;;  %v953_v25 = vld [vmem:[%s1275_s3 + $0x20] sm:$0xff]  }
   0x8   :  { %v54_v26 = vpack.c.bf16 %v44_v22, %v43_v21  ;;  %v55_v27 = vpack.c.bf16 %v46_v24, %v45_v23  ;;  %v47_v28 = vld [vmem:[%s1274_s0 + $0x70] sm:$0xff]  ;;  %v48_v29 = vld [vmem:[%s1274_s0 + $0x78] sm:$0xff]  ;;  %v954_v31 = vld [vmem:[%s1275_s3 + $0x28] sm:$0xff]  }
   0x9   :  { %v56_v30 = vpack.c.bf16 %v48_v29, %v47_v28  ;;  %v955_v32 = vld [vmem:[%s1275_s3 + $0x30] sm:$0xff]   ;;  %v956_v33 = vld [vmem:[%s1275_s3 + $0x38] sm:$0xff]   ;;  %v957_v34 = vld [vmem:[%s1276_s5] sm:$0xff]  }
   0xa   :  { %843 = vmatmul.mubr.msk.bf16.vlgmr.msra.gmra.mrb[0].mxu0 %vm80_vm0, %v50_v9  ;;  %861 = vmatpush3.bf16.msra.mxu1 %v950_v14  ;;  %v958_v35 = vld [vmem:[%s1276_s5 + $0x8] sm:$0xff]   ;;  %v959_v36 = vld [vmem:[%s1276_s5 + $0x10] sm:$0xff]   ;;  %v960_v37 = vld [vmem:[%s1276_s5 + $0x18] sm:$0xff]  }
   0xb   :  { %846 = vmatprep.mubr.msk.bf16.mxu0 %vm80_vm0, %v51_v10  ;;  %862 = vmatprep.subr.bf16.mxu1 %v951_v17  ;;  %v961_v38 = vld [vmem:[%s1276_s5 + $0x20] sm:$0xff]  }
   0xc   :  { %890 = vmatprep.subr.bf16.mxu0 %v957_v34  ;;  %v1122_v39 = vld [vmem:[%s1277_s2] ss:$0 sm:$0xff] }
   0xd   :  { %891 = vmatpush3.bf16.msra.mxu0 %v957_v34 }
   0xe   :  { %863 = vmatpush3.bf16.msra.mxu1 %v951_v17  ;;  %892 = vmatprep.subr.bf16.mxu0 %v958_v35 }
   0xf   :  { %864 = vmatprep.subr.bf16.mxu1 %v952_v20 }
  0x11   :  { %893 = vmatpush3.bf16.msra.mxu0 %v958_v35 }
  0x12   :  { %847 = vmatmul.mubr.msk.bf16.gmra.mrb[4].mxu0 %vm80_vm0, %v52_v18  ;;  %865 = vmatpush3.bf16.msra.mxu1 %v952_v20 }
  0x13   :  { %850 = vmatprep.mubr.msk.bf16.mxu0 %vm80_vm0, %v53_v19  ;;  %866 = vmatprep.subr.bf16.mxu1 %v953_v25 }
  0x14   :  { %894 = vmatprep.subr.bf16.mxu0 %v959_v36 }
  0x15   :  { %895 = vmatpush3.bf16.msra.mxu0 %v959_v36 }
  0x16   :  { %867 = vmatpush3.bf16.msra.mxu1 %v953_v25  ;;  %896 = vmatprep.subr.bf16.mxu0 %v960_v37 }
  0x17   :  { %868 = vmatprep.subr.bf16.mxu1 %v954_v31 }
  0x19   :  { %897 = vmatpush3.bf16.msra.mxu0 %v960_v37 }
  0x1a   :  { %851 = vmatmul.mubr.msk.bf16.gmra.mrb[8].mxu0 %vm80_vm0, %v54_v26  ;;  %869 = vmatpush3.bf16.msra.mxu1 %v954_v31 }
  0x1b   :  { %854 = vmatprep.mubr.msk.bf16.mxu0 %vm80_vm0, %v55_v27  ;;  %870 = vmatprep.subr.bf16.mxu1 %v955_v32 }
  0x1c   :  { %898 = vmatprep.subr.bf16.mxu0 %v961_v38 }
  0x1d   :  { %899 = vmatpush3.bf16.msra.mxu0 %v961_v38 }
  0x1e   :  { %871 = vmatpush3.bf16.msra.mxu1 %v955_v32 }
  0x1f   :  { %872 = vmatprep.subr.bf16.mxu1 %v956_v33 }
  0x22   :  { %855 = vmatmul.mubr.msk.bf16.gmra.mrb[12].mxu0 %vm80_vm0, %v56_v30  ;;  %873 = vmatpush3.bf16.msra.mxu1 %v956_v33 }
  0xdd   :  { %v844_v40 = vpop.f32.mrb[0].mxu0 }
  0xde   :  { %v148_v41 = vadd.f32 %v844_v40, %v1122_v39  ;;  %v139_v42 = vpop.f32.mrb[1].mxu0 }
  0xdf   :  { %v140_v43 = vadd.f32 %v1122_v39, %v139_v42  ;;  %v845_v44 = vpop.f32.mrb[2].mxu0 }
  0xe0   :  { %v151_v45 = vadd.f32 %v845_v44, %v1122_v39  ;;  %v142_v46 = vpop.f32.mrb[3].mxu0  ;;  %v204_v49 = vmul.f32 0.01, %v148_v41 }
  0xe1   :  { %v202_v47 = vmul.f32 0.01, %v140_v43  ;;  %v143_v48 = vadd.f32 %v1122_v39, %v142_v46 }
  0xe2   :  { %v205_v50 = vmul.f32 0.01, %v151_v45  ;;  %v1134_v56 = vmax.f32 %v148_v41, %v204_v49  ;;  %v963_v49 = vld [vmem:[%s1276_s5 + $0x30] sm:$0xff]  }
  0xe3   :  { %v203_v51 = vmul.f32 0.01, %v143_v48  ;;  %v1130_v54 = vmax.f32 %v140_v43, %v202_v47 }
  0xe4   :  { %v1128_v52 = vmax.f32 %v151_v45, %v205_v50  ;;  %v964_v50 = vld [vmem:[%s1276_s5 + $0x38] sm:$0xff]  }
  0xe5   :  { %v848_v53 = vpop.f32.mrb[4].mxu0  ;;  %v1132_v55 = vmax.f32 %v143_v48, %v203_v51  ;;  %v1200_v51 = vld [vmem:[%s1278_s4] ss:$0 sm:$0xff] }
  0xe6   :  { %v164_v57 = vadd.f32 %v848_v53, %v1122_v39  ;;  %v155_v58 = vpop.f32.mrb[5].mxu0  ;;  %v235_v1 = vpack.c.bf16 %v1128_v52, %v1134_v56 }
  0xe7   :  { %v156_v59 = vadd.f32 %v1122_v39, %v155_v58  ;;  %v849_v60 = vpop.f32.mrb[6].mxu0  ;;  %v234_v61 = vpack.c.bf16 %v1132_v55, %v1130_v54 }
  0xe8   :  { %v208_v62 = vmul.f32 0.01, %v164_v57  ;;  %v167_v63 = vadd.f32 %v849_v60, %v1122_v39  ;;  %v158_v0 = vpop.f32.mrb[7].mxu0 }
  0xe9   :  { %v206_v2 = vmul.f32 0.01, %v156_v59  ;;  %v159_v3 = vadd.f32 %v1122_v39, %v158_v0  ;;  %874 = vmatprep.mubr.bf16.mxu1 %v234_v61 }
  0xea   :  { %v1144_v4 = vmax.f32 %v164_v57, %v208_v62  ;;  %v209_v5 = vmul.f32 0.01, %v167_v63  ;;  %875 = vmatmul.mubr.bf16.vlgmr.msra.gmra.mrb[0].mxu1 %v235_v1 }
  0xeb   :  { %v1146_v6 = vmax.f32 %v156_v59, %v206_v2  ;;  %v207_v7 = vmul.f32 0.01, %v159_v3 }
  0xec   :  { %v1148_v8 = vmax.f32 %v167_v63, %v209_v5 }
  0xed   :  { %v1150_v9 = vmax.f32 %v159_v3, %v207_v7  ;;  %v852_v10 = vpop.f32.mrb[8].mxu0 }
  0xee   :  { %v180_v11 = vadd.f32 %v852_v10, %v1122_v39  ;;  %v171_v12 = vpop.f32.mrb[9].mxu0  ;;  %v237_v13 = vpack.c.bf16 %v1148_v8, %v1144_v4 }
  0xef   :  { %v172_v14 = vadd.f32 %v1122_v39, %v171_v12  ;;  %v853_v15 = vpop.f32.mrb[10].mxu0  ;;  %v236_v16 = vpack.c.bf16 %v1150_v9, %v1146_v6 }
  0xf0   :  { %v212_v17 = vmul.f32 0.01, %v180_v11  ;;  %v183_v18 = vadd.f32 %v853_v15, %v1122_v39  ;;  %v174_v19 = vpop.f32.mrb[11].mxu0 }
  0xf1   :  { %v210_v20 = vmul.f32 0.01, %v172_v14  ;;  %v175_v21 = vadd.f32 %v1122_v39, %v174_v19  ;;  %878 = vmatprep.mubr.bf16.mxu1 %v236_v16 }
  0xf2   :  { %v1160_v22 = vmax.f32 %v180_v11, %v212_v17  ;;  %v213_v23 = vmul.f32 0.01, %v183_v18  ;;  %879 = vmatmul.mubr.bf16.gmra.mrb[4].mxu1 %v237_v13 }
  0xf3   :  { %v1162_v24 = vmax.f32 %v172_v14, %v210_v20  ;;  %v211_v25 = vmul.f32 0.01, %v175_v21 }
  0xf4   :  { %v1164_v26 = vmax.f32 %v183_v18, %v213_v23 }
  0xf5   :  { %v1166_v27 = vmax.f32 %v175_v21, %v211_v25  ;;  %v856_v28 = vpop.f32.mrb[12].mxu0 }
  0xf6   :  { %v196_v29 = vadd.f32 %v856_v28, %v1122_v39  ;;  %v187_v30 = vpop.f32.mrb[13].mxu0  ;;  %v239_v31 = vpack.c.bf16 %v1164_v26, %v1160_v22 }
  0xf7   :  { %v188_v32 = vadd.f32 %v1122_v39, %v187_v30  ;;  %v857_v33 = vpop.f32.mrb[14].mxu0  ;;  %v238_v34 = vpack.c.bf16 %v1166_v27, %v1162_v24 }
  0xf8   :  { %v216_v35 = vmul.f32 0.01, %v196_v29  ;;  %v199_v36 = vadd.f32 %v857_v33, %v1122_v39  ;;  %v190_v37 = vpop.f32.mrb[15].mxu0 }
  0xf9   :  { %v214_v38 = vmul.f32 0.01, %v188_v32  ;;  %v191_v40 = vadd.f32 %v1122_v39, %v190_v37  ;;  %882 = vmatprep.mubr.bf16.mxu1 %v238_v34  ;;  %v962_v39 = vld [vmem:[%s1276_s5 + $0x28] sm:$0xff]  }
  0xfa   :  { %v1176_v41 = vmax.f32 %v196_v29, %v216_v35  ;;  %v217_v42 = vmul.f32 0.01, %v199_v36  ;;  %883 = vmatmul.mubr.bf16.gmra.mrb[8].mxu1 %v239_v31  ;;  %900 = vmatprep.subr.bf16.mxu0 %v962_v39 }
  0xfb   :  { %v1178_v43 = vmax.f32 %v188_v32, %v214_v38  ;;  %v215_v44 = vmul.f32 0.01, %v191_v40  ;;  %901 = vmatpush3.bf16.msra.mxu0 %v962_v39 }
  0xfc   :  { %v1180_v45 = vmax.f32 %v199_v36, %v217_v42  ;;  %902 = vmatprep.subr.bf16.mxu0 %v963_v49 }
  0xfd   :  { %v1182_v46 = vmax.f32 %v191_v40, %v215_v44 }
  0xfe   :  { %v241_v47 = vpack.c.bf16 %v1180_v45, %v1176_v41 }
  0xff   :  { %v240_v48 = vpack.c.bf16 %v1182_v46, %v1178_v43  ;;  %903 = vmatpush3.bf16.msra.mxu0 %v963_v49 }
 0x100   :  { %904 = vmatprep.subr.bf16.mxu0 %v964_v50 }
 0x101   :  { %886 = vmatprep.mubr.bf16.mxu1 %v240_v48 }
 0x102   :  { %887 = vmatmul.mubr.bf16.gmra.mrb[12].mxu1 %v241_v47 }
 0x103   :  { %905 = vmatpush3.bf16.msra.mxu0 %v964_v50 }
 0x1bd   :  { %v876_v53 = vpop.f32.mrb[0].mxu1 }
 0x1be   :  { %v356_v57 = vadd.f32 %v876_v53, %v1200_v51  ;;  %v347_v58 = vpop.f32.mrb[1].mxu1 }
 0x1bf   :  { %v348_v59 = vadd.f32 %v1200_v51, %v347_v58  ;;  %v877_v60 = vpop.f32.mrb[2].mxu1 }
 0x1c0   :  { %v412_v61 = vmul.f32 0.01, %v356_v57  ;;  %v359_v62 = vadd.f32 %v877_v60, %v1200_v51  ;;  %v350_v63 = vpop.f32.mrb[3].mxu1 }
 0x1c1   :  { %v410_v0 = vmul.f32 0.01, %v348_v59  ;;  %v351_v1 = vadd.f32 %v1200_v51, %v350_v63 }
 0x1c2   :  { %v413_v2 = vmul.f32 0.01, %v359_v62  ;;  %v428_v5 = vmax.f32 %v356_v57, %v412_v61 }
 0x1c3   :  { %v411_v3 = vmul.f32 0.01, %v351_v1  ;;  %v426_v10 = vmax.f32 %v348_v59, %v410_v0 }
 0x1c4   :  { %v429_v7 = vmax.f32 %v359_v62, %v413_v2 }
 0x1c5   :  { %v427_v11 = vmax.f32 %v351_v1, %v411_v3  ;;  %v880_v12 = vpop.f32.mrb[4].mxu1 }
 0x1c6   :  { %v443_v13 = vpack.c.bf16 %v429_v7, %v428_v5  ;;  %v372_v14 = vadd.f32 %v880_v12, %v1200_v51  ;;  %v363_v15 = vpop.f32.mrb[5].mxu1 }
 0x1c7   :  { %v364_v16 = vadd.f32 %v1200_v51, %v363_v15  ;;  %v881_v17 = vpop.f32.mrb[6].mxu1  ;;  %v442_v18 = vpack.c.bf16 %v427_v11, %v426_v10 }
 0x1c8   :  { %v416_v19 = vmul.f32 0.01, %v372_v14  ;;  %v375_v20 = vadd.f32 %v881_v17, %v1200_v51  ;;  %v366_v21 = vpop.f32.mrb[7].mxu1 }
 0x1c9   :  { %v414_v23 = vmul.f32 0.01, %v364_v16  ;;  %v367_v25 = vadd.f32 %v1200_v51, %v366_v21  ;;  %906 = vmatprep.mubr.bf16.mxu0 %v442_v18  ;;  %v1221_v21 = vld [vmem:[%s1279_s6] ss:$0 sm:$0xff] }
 0x1ca   :  { %v417_v28 = vmul.f32 0.01, %v375_v20  ;;  %907 = vmatmul.mubr.bf16.vlgmr.msra.gmra.mrb[16].mxu0 %v443_v13  ;;  %v432_v30 = vmax.f32 %v372_v14, %v416_v19 }
 0x1cb   :  { %v415_v29 = vmul.f32 0.01, %v367_v25  ;;  %v430_v32 = vmax.f32 %v364_v16, %v414_v23 }
 0x1cc   :  { %v433_v31 = vmax.f32 %v375_v20, %v417_v28 }
 0x1cd   :  { %v431_v33 = vmax.f32 %v367_v25, %v415_v29  ;;  %v884_v34 = vpop.f32.mrb[8].mxu1 }
 0x1ce   :  { %v388_v35 = vadd.f32 %v884_v34, %v1200_v51  ;;  %v379_v36 = vpop.f32.mrb[9].mxu1  ;;  %v445_v37 = vpack.c.bf16 %v433_v31, %v432_v30 }
 0x1cf   :  { %v380_v38 = vadd.f32 %v1200_v51, %v379_v36  ;;  %v885_v40 = vpop.f32.mrb[10].mxu1  ;;  %v444_v42 = vpack.c.bf16 %v431_v33, %v430_v32 }
 0x1d0   :  { %v420_v44 = vmul.f32 0.01, %v388_v35  ;;  %v391_v47 = vadd.f32 %v885_v40, %v1200_v51  ;;  %v382_v48 = vpop.f32.mrb[11].mxu1 }
 0x1d1   :  { %v418_v39 = vmul.f32 0.01, %v380_v38  ;;  %v383_v49 = vadd.f32 %v1200_v51, %v382_v48  ;;  %910 = vmatprep.mubr.bf16.mxu0 %v444_v42 }
 0x1d2   :  { %v436_v50 = vmax.f32 %v388_v35, %v420_v44  ;;  %v421_v53 = vmul.f32 0.01, %v391_v47  ;;  %911 = vmatmul.mubr.bf16.gmra.mrb[20].mxu0 %v445_v37 }
 0x1d3   :  { %v434_v57 = vmax.f32 %v380_v38, %v418_v39  ;;  %v419_v58 = vmul.f32 0.01, %v383_v49 }
 0x1d4   :  { %v437_v59 = vmax.f32 %v391_v47, %v421_v53 }
 0x1d5   :  { %v435_v60 = vmax.f32 %v383_v49, %v419_v58  ;;  %v888_v61 = vpop.f32.mrb[12].mxu1  ;;  %v965_v58 = vmov 0.0  }
 0x1d6   :  { %v404_v62 = vadd.f32 %v888_v61, %v1200_v51  ;;  %v395_v63 = vpop.f32.mrb[13].mxu1  ;;  %v447_v0 = vpack.c.bf16 %v437_v59, %v436_v50  ;;  %922 = vmatprep.subr.bf16.mxu1 %v965_v58  ;;  %938 = vmatprep.mubr.msk.bf16.mxu1 %vm966_vm1, %v965_v58 }
 0x1d7   :  { %v396_v1 = vadd.f32 %v1200_v51, %v395_v63  ;;  %v889_v2 = vpop.f32.mrb[14].mxu1  ;;  %v446_v3 = vpack.c.bf16 %v435_v60, %v434_v57 }
 0x1d8   :  { %v424_v5 = vmul.f32 0.01, %v404_v62  ;;  %v407_v7 = vadd.f32 %v889_v2, %v1200_v51  ;;  %v398_v10 = vpop.f32.mrb[15].mxu1 }
 0x1d9   :  { %v422_v11 = vmul.f32 0.01, %v396_v1  ;;  %v399_v12 = vadd.f32 %v1200_v51, %v398_v10  ;;  %914 = vmatprep.mubr.bf16.mxu0 %v446_v3 }
 0x1da   :  { %v440_v13 = vmax.f32 %v404_v62, %v424_v5  ;;  %v425_v14 = vmul.f32 0.01, %v407_v7  ;;  %915 = vmatmul.mubr.bf16.gmra.mrb[24].mxu0 %v447_v0 }
 0x1db   :  { %v438_v15 = vmax.f32 %v396_v1, %v422_v11  ;;  %v423_v16 = vmul.f32 0.01, %v399_v12 }
 0x1dc   :  { %v441_v17 = vmax.f32 %v407_v7, %v425_v14 }
 0x1dd   :  { %v439_v18 = vmax.f32 %v399_v12, %v423_v16 }
 0x1de   :  { %v449_v19 = vpack.c.bf16 %v441_v17, %v440_v13 }
 0x1df   :  { %v448_v20 = vpack.c.bf16 %v439_v18, %v438_v15 }
 0x1e1   :  { %918 = vmatprep.mubr.bf16.mxu0 %v448_v20 }
 0x1e2   :  { %919 = vmatmul.mubr.bf16.gmra.mrb[28].mxu0 %v449_v19 }
 0x29d   :  { %v908_v23 = vpop.f32.mrb[16].mxu0 }
 0x29e   :  { %v555_v25 = vpop.f32.mrb[17].mxu0  ;;  %v564_v30 = vadd.f32 %v908_v23, %v1221_v21 }
 0x29f   :  { %v556_v51 = vadd.f32 %v1221_v21, %v555_v25  ;;  %v909_v28 = vpop.f32.mrb[18].mxu0 }
 0x2a0   :  { %v558_v29 = vpop.f32.mrb[19].mxu0  ;;  %v620_v35 = vadd.f32 %v564_v30, %v1134_v56  ;;  %v567_v36 = vadd.f32 %v909_v28, %v1221_v21 }
 0x2a1   :  { %v559_v31 = vadd.f32 %v1221_v21, %v558_v29  ;;  %v618_v32 = vadd.f32 %v556_v51, %v1130_v54 }
 0x2a2   :  { %v621_v48 = vadd.f32 %v567_v36, %v1128_v52  ;;  %v636_v54 = vmul.f32 0.01, %v620_v35 }
 0x2a3   :  { %v619_v33 = vadd.f32 %v559_v31, %v1132_v55  ;;  %v634_v34 = vmul.f32 0.01, %v618_v32 }
 0x2a4   :  { %v652_v53 = vmax.f32 %v620_v35, %v636_v54  ;;  %v637_v57 = vmul.f32 0.01, %v621_v48 }
 0x2a5   :  { %v912_v37 = vpop.f32.mrb[20].mxu0  ;;  %v650_v38 = vmax.f32 %v618_v32, %v634_v34  ;;  %v635_v40 = vmul.f32 0.01, %v619_v33 }
 0x2a6   :  { %v571_v42 = vpop.f32.mrb[21].mxu0  ;;  %v580_v52 = vadd.f32 %v912_v37, %v1221_v21  ;;  %v653_v63 = vmax.f32 %v621_v48, %v637_v57 }
 0x2a7   :  { %v913_v44 = vpop.f32.mrb[22].mxu0  ;;  %666 = vxpose.xlu0.b32.start [1/16] %v650_v38, 128  ;;  %v572_v39 = vadd.f32 %v1221_v21, %v571_v42  ;;  %v651_v49 = vmax.f32 %v619_v33, %v635_v40 }
 0x2a8   :  { %v574_v47 = vpop.f32.mrb[23].mxu0  ;;  %v583_v1 = vadd.f32 %v913_v44, %v1221_v21 }
 0x2a9   :  { %v622_v55 = vadd.f32 %v572_v39, %v1146_v6  ;;  %v575_v56 = vadd.f32 %v1221_v21, %v574_v47  ;;  %v624_v6 = vadd.f32 %v580_v52, %v1144_v4 }
 0x2aa   :  { %v625_v12 = vadd.f32 %v583_v1, %v1148_v8 }
 0x2ab   :  { %667 = vxpose.xlu0.b32.cont [2/16] %v651_v49, 128  ;;  %v623_v62 = vadd.f32 %v575_v56, %v1150_v9  ;;  %v638_v0 = vmul.f32 0.01, %v622_v55  ;;  %v640_v9 = vmul.f32 0.01, %v624_v6 }
 0x2ac   :  { %v641_v17 = vmul.f32 0.01, %v625_v12 }
 0x2ad   :  { %v916_v50 = vpop.f32.mrb[24].mxu0  ;;  %v654_v3 = vmax.f32 %v622_v55, %v638_v0  ;;  %v639_v5 = vmul.f32 0.01, %v623_v62  ;;  %v656_v16 = vmax.f32 %v624_v6, %v640_v9 }
 0x2ae   :  { %v587_v59 = vpop.f32.mrb[25].mxu0  ;;  %v596_v18 = vadd.f32 %v916_v50, %v1221_v21  ;;  %v657_v20 = vmax.f32 %v625_v12, %v641_v17 }
 0x2af   :  { %v917_v60 = vpop.f32.mrb[26].mxu0  ;;  %668 = vxpose.xlu0.b32.cont [3/16] %v652_v53, 128  ;;  %v588_v13 = vadd.f32 %v1221_v21, %v587_v59  ;;  %v655_v14 = vmax.f32 %v623_v62, %v639_v5 }
 0x2b0   :  { %v590_v61 = vpop.f32.mrb[27].mxu0  ;;  %v628_v8 = vadd.f32 %v596_v18, %v1160_v22  ;;  %v599_v25 = vadd.f32 %v917_v60, %v1221_v21 }
 0x2b1   :  { %v626_v15 = vadd.f32 %v588_v13, %v1162_v24  ;;  %v591_v4 = vadd.f32 %v1221_v21, %v590_v61  ;;  %v706_v13 = vld [vmem:[%s1281_s7] sm:$0xf] }
 0x2b2   :  { %v629_v24 = vadd.f32 %v599_v25, %v1164_v26  ;;  %v644_v31 = vmul.f32 0.01, %v628_v8 }
 0x2b3   :  { %669 = vxpose.xlu0.b32.cont [4/16] %v653_v63, 128  ;;  %v627_v19 = vadd.f32 %v591_v4, %v1166_v27  ;;  %v642_v23 = vmul.f32 0.01, %v626_v15 }
 0x2b4   :  { %v660_v33 = vmax.f32 %v628_v8, %v644_v31  ;;  %v645_v34 = vmul.f32 0.01, %v629_v24 }
 0x2b5   :  { %v920_v2 = vpop.f32.mrb[28].mxu0  ;;  %v658_v51 = vmax.f32 %v626_v15, %v642_v23  ;;  %v643_v28 = vmul.f32 0.01, %v627_v19 }
 0x2b6   :  { %v603_v7 = vpop.f32.mrb[29].mxu0  ;;  %v612_v22 = vadd.f32 %v920_v2, %v1221_v21  ;;  %v661_v36 = vmax.f32 %v629_v24, %v645_v34 }
 0x2b7   :  { %v921_v10 = vpop.f32.mrb[30].mxu0  ;;  %670 = vxpose.xlu0.b32.cont [5/16] %v654_v3, 128  ;;  %v604_v29 = vadd.f32 %v1221_v21, %v603_v7  ;;  %v659_v30 = vmax.f32 %v627_v19, %v643_v28 }
 0x2b8   :  { %v606_v11 = vpop.f32.mrb[31].mxu0  ;;  %v632_v26 = vadd.f32 %v612_v22, %v1176_v41  ;;  %v615_v38 = vadd.f32 %v921_v10, %v1221_v21  ;;  %v707_v41 = vld [vmem:[%s1280_s8] sm:$0xff] }
 0x2b9   :  { %v630_v32 = vadd.f32 %v604_v29, %v1178_v43  ;;  %v607_v27 = vadd.f32 %v1221_v21, %v606_v11 }
 0x2ba   :  { %v633_v43 = vadd.f32 %v615_v38, %v1180_v45  ;;  %v648_v47 = vmul.f32 0.01, %v632_v26 }
 0x2bb   :  { %671 = vxpose.xlu0.b32.cont [6/16] %v655_v14, 128  ;;  %v631_v35 = vadd.f32 %v607_v27, %v1182_v46  ;;  %v646_v37 = vmul.f32 0.01, %v630_v32  ;;  %v967_v46 = vmov 0  }
 0x2bc   :  { %v664_v48 = vmax.f32 %v632_v26, %v648_v47  ;;  %v649_v39 = vmul.f32 0.01, %v633_v43  ;;  %945 = vset.pattern.permute.xlu1 %v967_v46 }
 0x2bd   :  { %v662_v40 = vmax.f32 %v630_v32, %v646_v37  ;;  %v647_v42 = vmul.f32 0.01, %v631_v35  ;;  %710 = vperm.xlu1 %945, %v707_v41  }
 0x2be   :  { %v665_v49 = vmax.f32 %v633_v43, %v649_v39 }
 0x2bf   :  { %672 = vxpose.xlu0.b32.cont [7/16] %v656_v16, 128  ;;  %v663_v44 = vmax.f32 %v631_v35, %v647_v42 }
 0x2c3   :  { %673 = vxpose.xlu0.b32.cont [8/16] %v657_v20, 128 }
 0x2c7   :  { %674 = vxpose.xlu0.b32.cont [9/16] %v658_v51, 128 }
 0x2cb   :  { %675 = vxpose.xlu0.b32.cont [10/16] %v659_v30, 128 }
 0x2cf   :  { %676 = vxpose.xlu0.b32.cont [11/16] %v660_v33, 128 }
 0x2d3   :  { %677 = vxpose.xlu0.b32.cont [12/16] %v661_v36, 128 }
 0x2d7   :  { %678 = vxpose.xlu0.b32.cont [13/16] %v662_v40, 128 }
 0x2db   :  { %679 = vxpose.xlu0.b32.cont [14/16] %v663_v44, 128 }
 0x2df   :  { %680 = vxpose.xlu0.b32.cont [15/16] %v664_v48, 128 }
 0x2e3   :  { %681 = vxpose.xlu0.b32.end [16/16] %v665_v49, 128 }
 0x30c   :  { %946 = vset.pattern.permute.xlu0 %v967_v46 }
 0x327   :  { %v682_v45 = vpop.trf.xlu0 }
 0x32b   :  { %v683_v21 = vpop.trf.xlu0 }
 0x32c   :  { %v698_v54 = vpack.c.bf16 %v683_v21, %v682_v45 }
 0x32e   :  { %923 = vmatpush3.bf16.msra.mxu1 %v698_v54 }
 0x32f   :  { %v684_v55 = vpop.trf.xlu0  ;;  %924 = vmatprep.subr.bf16.mxu1 %v965_v58 }
 0x333   :  { %v685_v56 = vpop.trf.xlu0 }
 0x334   :  { %v699_v50 = vpack.c.bf16 %v685_v56, %v684_v55 }
 0x336   :  { %925 = vmatpush3.bf16.msra.mxu1 %v699_v50 }
 0x337   :  { %v686_v53 = vpop.trf.xlu0  ;;  %926 = vmatprep.subr.bf16.mxu1 %v965_v58 }
 0x33b   :  { %v687_v57 = vpop.trf.xlu0 }
 0x33c   :  { %v700_v59 = vpack.c.bf16 %v687_v57, %v686_v53  ;;  %v711_v14 = vpop.permute.xlu1 %710 }
 0x33e   :  { %927 = vmatpush3.bf16.msra.mxu1 %v700_v59 }
 0x33f   :  { %v688_v60 = vpop.trf.xlu0  ;;  %928 = vmatprep.subr.bf16.mxu1 %v965_v58 }
 0x343   :  { %v689_v61 = vpop.trf.xlu0 }
 0x344   :  { %v701_v52 = vpack.c.bf16 %v689_v61, %v688_v60 }
 0x346   :  { %929 = vmatpush3.bf16.msra.mxu1 %v701_v52 }
 0x347   :  { %v690_v62 = vpop.trf.xlu0  ;;  %930 = vmatprep.subr.bf16.mxu1 %v965_v58 }
 0x34b   :  { %v691_v63 = vpop.trf.xlu0 }
 0x34c   :  { %v702_v0 = vpack.c.bf16 %v691_v63, %v690_v62 }
 0x34e   :  { %931 = vmatpush3.bf16.msra.mxu1 %v702_v0 }
 0x34f   :  { %v692_v6 = vpop.trf.xlu0  ;;  %932 = vmatprep.subr.bf16.mxu1 %v965_v58 }
 0x353   :  { %v693_v1 = vpop.trf.xlu0 }
 0x354   :  { %v703_v2 = vpack.c.bf16 %v693_v1, %v692_v6 }
 0x356   :  { %933 = vmatpush3.bf16.msra.mxu1 %v703_v2 }
 0x357   :  { %v694_v3 = vpop.trf.xlu0  ;;  %934 = vmatprep.subr.bf16.mxu1 %v965_v58 }
 0x35b   :  { %v695_v5 = vpop.trf.xlu0 }
 0x35c   :  { %v704_v7 = vpack.c.bf16 %v695_v5, %v694_v3 }
 0x35e   :  { %935 = vmatpush3.bf16.msra.mxu1 %v704_v7 }
 0x35f   :  { %v696_v10 = vpop.trf.xlu0  ;;  %936 = vmatprep.subr.bf16.mxu1 %v965_v58 }
 0x363   :  { %v697_v11 = vpop.trf.xlu0 }
 0x364   :  { %v705_v12 = vpack.c.bf16 %v697_v11, %v696_v10 }
 0x366   :  { %937 = vmatpush3.bf16.msra.mxu1 %v705_v12 }
 0x369   :  { %939 = vmatmul.mubr.bf16.vlgmr.msra.gmra.mrb[16].mxu1 %v706_v13 }
 0x43c   :  { %v747_v9 = vpop.f32.mrb[16].mxu1 }
 0x43d   :  { %v748_v15 = vadd.f32 %v747_v9, %v711_v14  ;;  %v940_v4 = vpop.f32.mrb[17].mxu1 }
 0x43e   :  { %v750_v16 = vpop.f32.mrb[18].mxu1 }
 0x43f   :  { %753 = vst [vmem:[%s1282_s9] sm:$0xff] %v748_v15  ;;  %v941_v17 = vpop.f32.mrb[19].mxu1 }

</bundles_post_ra>
